<compile_context>
chip_gen: v7x
topology: tpu7x:2x2x1
jax: 0.10.0
libtpu: 0.0.40
codegen_flags: <defaults>
</compile_context>

<pallas_src>
import jax
import jax.numpy as jnp
from jax.experimental import pallas as pl
from jax.experimental.pallas import tpu as pltpu


# ----------------------------- Pallas kernel ------------------------------ #
def _make_disc_kernel(L, Dc, P_real, P_pad, eps=1e-5, unroll_limit=8):
    """Build the fused kernel for static (L, Dc, P_real, P_pad).

    Kernel refs:
      xc_ref  : (K*K*Cin + 1, P_pad)  im2col + ones row (zero on padded lanes)
      w1_ref  : (Dc, K*K*Cin + 1)     folded first-layer weight | bias column
      wfb_ref : (L, Dc, Dc)           1x1 conv weights (biases cancel in BN)
      gb_ref  : (L, 2, Dc, 1)         [gamma, beta] per layer
      wfbf_ref: (2, Dc)               row0 = final weight, row1[0] = final bias
      o_ref   : (1, P_pad)            sigmoid output, lane-dense
    """
    inv_p = 1.0 / float(P_real)
    need_mask = P_real != P_pad

    def kernel(xc_ref, w1_ref, wfb_ref, gb_ref, wfbf_ref, o_ref):
        if need_mask:
            # Lane-validity mask, built once (hoisted out of the layer loop).
            lane = jax.lax.broadcasted_iota(jnp.int32, (1, P_pad), 1)
            maskf = (lane < P_real).astype(jnp.float32)

        # ---- first_layer: one MXU matmul, bias folded into the contraction.
        # Padded lanes of xc (incl. the ones row) are zero => y is zero there.
        y = jnp.dot(w1_ref[...], xc_ref[...],
                    preferred_element_type=jnp.float32)            # (Dc, P_pad)

        # ---- feature_block: [1x1 conv -> BatchNorm(batch stats) -> ReLU] * L
        def layer(l, y):
            z = jnp.dot(wfb_ref[l], y,
                        preferred_element_type=jnp.float32)        # (Dc, P_pad)
            gb = gb_ref[l]                                         # (2, Dc, 1)
            # Two independent lane reductions (overlapping XLU pushes).
            s1 = jnp.sum(z, axis=-1, keepdims=True)                # (Dc, 1)
            s2 = jnp.sum(z * z, axis=-1, keepdims=True)            # (Dc, 1)
            mean = s1 * inv_p
            var = s2 * inv_p - mean * mean                         # biased var
            scale = jax.lax.rsqrt(var + eps) * gb[0]               # (Dc, 1)
            shift = gb[1] - mean * scale                           # (Dc, 1)
            act = jnp.maximum(z * scale + shift, 0.0)
            # Keep padded lanes at exactly zero so the next layer's BN sums
            # (which divide by the real pixel count) stay uncontaminated.
            return act * maskf if need_mask else act

        if L <= unroll_limit:
            for l in range(L):          # small L: full unroll (static indices)
                y = layer(l, y)
        else:
            # Scale-up guard: bounded live ranges, no vreg spills at large L/Dc.
            y = jax.lax.fori_loop(0, L, layer, y)

        # ---- final_layer: 1x1 conv to 1 channel -> sigmoid (lane-dense store)
        wf = wfbf_ref[0:1, :]                                      # (1, Dc)
        bf = wfbf_ref[1:2, 0:1]                                    # (1, 1)
        logits = jnp.dot(wf, y, preferred_element_type=jnp.float32) + bf
        o_ref[...] = jax.nn.sigmoid(logits)

    return kernel


# ------------------------------- wrapper ----------------------------------- #
def _im2col_with_bias_row(x, K, P_pad):
    """(N, Cin, H, W) -> (K*K*Cin + 1, P_pad), rows ordered (dy, dx, cin), plus
    a trailing ones row (first-layer bias). Padded lanes are zero everywhere
    (including the ones row) so padded pixels stay exactly zero in the kernel."""
    N, Cin, H, W = x.shape
    Ho, Wo = H - K + 1, W - K + 1
    P = N * Ho * Wo
    cols = [x[:, :, dy:dy + Ho, dx:dx + Wo]
            for dy in range(K) for dx in range(K)]          # each (N,Cin,Ho,Wo)
    xc = jnp.stack(cols, axis=0)                            # (K*K, N, Cin, Ho, Wo)
    xc = jnp.transpose(xc, (0, 2, 1, 3, 4)).reshape(K * K * Cin, P)
    xc = jnp.concatenate([xc, jnp.ones((1, P), xc.dtype)], axis=0)
    return jnp.pad(xc, ((0, 0), (0, P_pad - P)))


@jax.jit
def discriminator_forward(x_nchw, params):
    """x_nchw: (N, Cin, H, W) float32 -> (N, 1, Ho, Wo) float32 (PyTorch layout)."""
    w1f, b1, wfb, bfb, gamma, beta, wf, bf = params
    del bfb  # 1x1-conv bias immediately followed by BatchNorm cancels exactly.
    x = x_nchw.astype(jnp.float32)
    N, Cin, H, W = x.shape
    Dc = w1f.shape[0]
    K = int(round((w1f.shape[1] // Cin) ** 0.5))
    L = wfb.shape[0]
    Ho, Wo = H - K + 1, W - K + 1
    P = N * Ho * Wo
    P_pad = max(128, ((P + 127) // 128) * 128)              # lane-dense width

    # Packed / folded kernel operands (tiny boundary ops, fused by XLA).
    x_col = _im2col_with_bias_row(x, K, P_pad)              # (KKCin+1, P_pad)
    w1b = jnp.concatenate([w1f, b1], axis=1)                # (Dc, KKCin+1)
    gb = jnp.stack([gamma, beta], axis=1)                   # (L, 2, Dc, 1)
    wfbf = jnp.concatenate(
        [wf, jnp.pad(bf, ((0, 0), (0, Dc - 1)))], axis=0)   # (2, Dc)

    # Scale-up guard: everything must fit VMEM on the smallest-VMEM chip
    # (v7x: 64 MiB physical, 32 MiB default scoped). Beyond this, tile P with a
    # grid + BlockSpecs, split BN into partial sum/sum^2 passes, and set
    # pltpu.CompilerParams(vmem_limit_bytes=...) explicitly.
    kern_bytes = 4 * (x_col.size + w1b.size + wfb.size + gb.size
                      + wfbf.size + P_pad)
    assert kern_bytes < 16 * 1024 * 1024, "tile over P with a grid at this size"

    vmem = pl.BlockSpec(memory_space=pltpu.MemorySpace.VMEM)
    out = pl.pallas_call(
        _make_disc_kernel(L, Dc, P, P_pad),
        out_shape=jax.ShapeDtypeStruct((1, P_pad), jnp.float32),
        in_specs=[vmem] * 5,
        out_specs=vmem,
    )(x_col, w1b, wfb, gb, wfbf)

    # Drop padded lanes, contiguous reshape back to NCHW.
    return out[:, :P].reshape(N, 1, Ho, Wo)


# --------------------------- parameter creation ----------------------------- #
def _spectral_normalize_2d(w2d):
    """Divide by the exact largest singular value of the 2-D weight view."""
    sigma = jnp.linalg.svd(w2d, compute_uv=False)[0]
    return w2d / sigma


def make_params(key, img_channel, D_chan, D_kernel_size, D_n_layers):
    k = jax.random.split(key, 6)
    K, Cin, Dc = D_kernel_size, img_channel, D_chan
    L = D_n_layers - 2

    # first conv: built as (K, K, Cin, Dc), folded to (Dc, K*K*Cin) with column
    # order (dy, dx, cin) matching _im2col_with_bias_row's row order. Spectral
    # norm on the (out, in*K*K) view (column permutation preserves sigma).
    w1 = jax.random.normal(k[0], (K, K, Cin, Dc), jnp.float32) * 0.1
    w1f = _spectral_normalize_2d(w1.reshape(K * K * Cin, Dc).T)      # (Dc, KKCin)
    b1 = jax.random.normal(k[1], (Dc, 1), jnp.float32) * 0.01

    # feature block 1x1 convs, layout (L, out=Dc, in=Dc)
    wfb = jax.random.normal(k[2], (L, Dc, Dc), jnp.float32) * 0.1
    wfb = jax.vmap(_spectral_normalize_2d)(wfb)
    bfb = jax.random.normal(k[3], (L, Dc, 1), jnp.float32) * 0.01

    # BatchNorm2d affine params (PyTorch init: gamma=1, beta=0)
    gamma = jnp.ones((L, Dc, 1), jnp.float32)
    beta = jnp.zeros((L, Dc, 1), jnp.float32)

    # final 1x1 conv to 1 channel, layout (out=1, in=Dc)
    wf = _spectral_normalize_2d(jax.random.normal(k[4], (1, Dc), jnp.float32) * 0.1)
    bf = jax.random.normal(k[5], (1, 1), jnp.float32) * 0.01

    return (w1f, b1, wfb, bfb, gamma, beta, wf, bf)


# ---------------------------- pure-JAX reference ---------------------------- #
def reference_forward(x_nchw, params):
    """Literal translation of the PyTorch module (keeps all conv biases)."""
    w1f, b1, wfb, bfb, gamma, beta, wf, bf = params
    N, Cin, H, W = x_nchw.shape
    Dc = w1f.shape[0]
    K = int(round((w1f.shape[1] // Cin) ** 0.5))

    # Rebuild the standard OIHW conv kernel from the folded weight.
    w_conv = jnp.transpose(w1f.reshape(Dc, K, K, Cin), (0, 3, 1, 2))   # (Dc,Cin,K,K)
    y = jax.lax.conv_general_dilated(
        x_nchw.astype(jnp.float32), w_conv, (1, 1), 'VALID',
        dimension_numbers=('NCHW', 'OIHW', 'NCHW'),
        precision=jax.lax.Precision.HIGHEST)
    y = y + b1.reshape(1, -1, 1, 1)

    for l in range(wfb.shape[0]):
        z = jnp.einsum('oc,nchw->nohw', wfb[l], y,
                       precision='highest') + bfb[l].reshape(1, -1, 1, 1)
        mean = jnp.mean(z, axis=(0, 2, 3), keepdims=True)
        var = jnp.mean((z - mean) ** 2, axis=(0, 2, 3), keepdims=True)
        z = ((z - mean) / jnp.sqrt(var + 1e-5) * gamma[l].reshape(1, -1, 1, 1)
             + beta[l].reshape(1, -1, 1, 1))
        y = jnp.maximum(z, 0.0)

    logits = jnp.einsum('oc,nchw->nohw', wf, y,
                        precision='highest') + bf.reshape(1, -1, 1, 1)
    return jax.nn.sigmoid(logits)


# --------------------------------- main ------------------------------------ #
if __name__ == "__main__":
    # opt (small, consistent with the module): img_channel=4, D_chan=32,
    # D_kernel_size=3, D_n_layers=4 (=> 2 feature-block layers), crop=16
    img_channel, D_chan, D_kernel_size, D_n_layers = 4, 32, 3, 4
    N, H, W = 2, 16, 16

    key = jax.random.PRNGKey(0)
    kx, kp = jax.random.split(key)
    x = jax.random.normal(kx, (N, img_channel, H, W), jnp.float32)
    params = make_params(kp, img_channel, D_chan, D_kernel_size, D_n_layers)

    out = jax.block_until_ready(discriminator_forward(x, params))
    ref = jax.block_until_ready(reference_forward(x, params))

    assert out.shape == (N, 1, H - D_kernel_size + 1, W - D_kernel_size + 1)
    assert jnp.allclose(out, ref, atol=1e-4, rtol=1e-4), "mismatch vs reference"

    print("KERNEL_OK")
</pallas_src>

<mosaic_0001>
module attributes {stable_mosaic.version = 11 : i64} {
  func.func @kernel(%arg0: memref<37x512xf32, #tpu.memory_space<vmem>>, %arg1: memref<32x37xf32, #tpu.memory_space<vmem>>, %arg2: memref<2x32x32xf32, #tpu.memory_space<vmem>>, %arg3: memref<2x2x32x1xf32, #tpu.memory_space<vmem>>, %arg4: memref<2x32xf32, #tpu.memory_space<vmem>>, %arg5: memref<1x512xf32, #tpu.memory_space<vmem>>) attributes {dimension_semantics = [], scalar_prefetch = 0 : i64, scratch_operands = 0 : i64, tpu.core_type = #tpu.core_type<tc>} {
    %0 = tpu.iota {dimensions = array<i32: 1>} : vector<1x512xi32>
    %c392_i32 = arith.constant 392 : i32
    %1 = vector.broadcast %c392_i32 : i32 to vector<1x512xi32>
    %2 = arith.cmpi slt, %0, %1 : vector<1x512xi32>
    %3 = arith.extui %2 : vector<1x512xi1> to vector<1x512xi32>
    %4 = arith.sitofp %3 : vector<1x512xi32> to vector<1x512xf32>
    %c0 = arith.constant 0 : index
    %c0_0 = arith.constant 0 : index
    %5 = vector.load %arg1[%c0, %c0_0] : memref<32x37xf32, #tpu.memory_space<vmem>>, vector<32x37xf32>
    %c0_1 = arith.constant 0 : index
    %c0_2 = arith.constant 0 : index
    %6 = vector.load %arg0[%c0_1, %c0_2] : memref<37x512xf32, #tpu.memory_space<vmem>>, vector<37x512xf32>
    %cst = arith.constant dense<0.000000e+00> : vector<32x512xf32>
    %7 = tpu.matmul %5, %6, %cst {dimension_numbers = #tpu.dot_dimension_numbers<[1], [0], [0], [1], [0, 0, 1, 1], [], []>} : vector<32x37xf32>, vector<37x512xf32>, vector<32x512xf32> -> vector<32x512xf32>
    %c0_3 = arith.constant 0 : index
    %c0_4 = arith.constant 0 : index
    %c0_5 = arith.constant 0 : index
    %8 = vector.load %arg2[%c0_3, %c0_4, %c0_5] : memref<2x32x32xf32, #tpu.memory_space<vmem>>, vector<1x32x32xf32>
    %9 = vector.shape_cast %8 : vector<1x32x32xf32> to vector<32x32xf32>
    %cst_6 = arith.constant dense<0.000000e+00> : vector<32x512xf32>
    %10 = tpu.matmul %9, %7, %cst_6 {dimension_numbers = #tpu.dot_dimension_numbers<[1], [0], [0], [1], [0, 0, 1, 1], [], []>} : vector<32x32xf32>, vector<32x512xf32>, vector<32x512xf32> -> vector<32x512xf32>
    %c0_7 = arith.constant 0 : index
    %c0_8 = arith.constant 0 : index
    %c0_9 = arith.constant 0 : index
    %c0_10 = arith.constant 0 : index
    %11 = vector.load %arg3[%c0_7, %c0_8, %c0_9, %c0_10] : memref<2x2x32x1xf32, #tpu.memory_space<vmem>>, vector<1x2x32x1xf32>
    %12 = vector.shape_cast %11 : vector<1x2x32x1xf32> to vector<2x32x1xf32>
    %cst_11 = arith.constant dense<0.000000e+00> : vector<32xf32>
    %13 = vector.multi_reduction <add>, %10, %cst_11 [1] : vector<32x512xf32> to vector<32xf32>
    %14 = vector.shape_cast %13 : vector<32xf32> to vector<32x1xf32>
    %15 = arith.mulf %10, %10 : vector<32x512xf32>
    %cst_12 = arith.constant dense<0.000000e+00> : vector<32xf32>
    %16 = vector.multi_reduction <add>, %15, %cst_12 [1] : vector<32x512xf32> to vector<32xf32>
    %17 = vector.shape_cast %16 : vector<32xf32> to vector<32x1xf32>
    %cst_13 = arith.constant 0.00255102036 : f32
    %18 = vector.broadcast %cst_13 : f32 to vector<32x1xf32>
    %19 = arith.mulf %14, %18 : vector<32x1xf32>
    %cst_14 = arith.constant 0.00255102036 : f32
    %20 = vector.broadcast %cst_14 : f32 to vector<32x1xf32>
    %21 = arith.mulf %17, %20 : vector<32x1xf32>
    %22 = arith.mulf %19, %19 : vector<32x1xf32>
    %23 = arith.subf %21, %22 : vector<32x1xf32>
    %cst_15 = arith.constant 9.99999974E-6 : f32
    %24 = vector.broadcast %cst_15 : f32 to vector<32x1xf32>
    %25 = arith.addf %23, %24 : vector<32x1xf32>
    %26 = math.rsqrt %25 : vector<32x1xf32>
    %27 = vector.extract_strided_slice %12 {offsets = [0, 0, 0], sizes = [1, 32, 1], strides = [1, 1, 1]} : vector<2x32x1xf32> to vector<1x32x1xf32>
    %28 = vector.shape_cast %27 : vector<1x32x1xf32> to vector<32x1xf32>
    %29 = arith.mulf %26, %28 : vector<32x1xf32>
    %30 = vector.extract_strided_slice %12 {offsets = [1, 0, 0], sizes = [1, 32, 1], strides = [1, 1, 1]} : vector<2x32x1xf32> to vector<1x32x1xf32>
    %31 = vector.shape_cast %30 : vector<1x32x1xf32> to vector<32x1xf32>
    %32 = arith.mulf %19, %29 : vector<32x1xf32>
    %33 = arith.subf %31, %32 : vector<32x1xf32>
    %34 = vector.broadcast %29 : vector<32x1xf32> to vector<32x512xf32>
    %35 = arith.mulf %10, %34 : vector<32x512xf32>
    %36 = vector.broadcast %33 : vector<32x1xf32> to vector<32x512xf32>
    %37 = arith.addf %35, %36 : vector<32x512xf32>
    %cst_16 = arith.constant 0.000000e+00 : f32
    %38 = vector.broadcast %cst_16 : f32 to vector<32x512xf32>
    %39 = arith.maximumf %37, %38 : vector<32x512xf32>
    %40 = vector.broadcast %4 : vector<1x512xf32> to vector<32x512xf32>
    %41 = arith.mulf %39, %40 : vector<32x512xf32>
    %c1 = arith.constant 1 : index
    %c0_17 = arith.constant 0 : index
    %c0_18 = arith.constant 0 : index
    %42 = vector.load %arg2[%c1, %c0_17, %c0_18] : memref<2x32x32xf32, #tpu.memory_space<vmem>>, vector<1x32x32xf32>
    %43 = vector.shape_cast %42 : vector<1x32x32xf32> to vector<32x32xf32>
    %cst_19 = arith.constant dense<0.000000e+00> : vector<32x512xf32>
    %44 = tpu.matmul %43, %41, %cst_19 {dimension_numbers = #tpu.dot_dimension_numbers<[1], [0], [0], [1], [0, 0, 1, 1], [], []>} : vector<32x32xf32>, vector<32x512xf32>, vector<32x512xf32> -> vector<32x512xf32>
    %c1_20 = arith.constant 1 : index
    %c0_21 = arith.constant 0 : index
    %c0_22 = arith.constant 0 : index
    %c0_23 = arith.constant 0 : index
    %45 = vector.load %arg3[%c1_20, %c0_21, %c0_22, %c0_23] : memref<2x2x32x1xf32, #tpu.memory_space<vmem>>, vector<1x2x32x1xf32>
    %46 = vector.shape_cast %45 : vector<1x2x32x1xf32> to vector<2x32x1xf32>
    %cst_24 = arith.constant dense<0.000000e+00> : vector<32xf32>
    %47 = vector.multi_reduction <add>, %44, %cst_24 [1] : vector<32x512xf32> to vector<32xf32>
    %48 = vector.shape_cast %47 : vector<32xf32> to vector<32x1xf32>
    %49 = arith.mulf %44, %44 : vector<32x512xf32>
    %cst_25 = arith.constant dense<0.000000e+00> : vector<32xf32>
    %50 = vector.multi_reduction <add>, %49, %cst_25 [1] : vector<32x512xf32> to vector<32xf32>
    %51 = vector.shape_cast %50 : vector<32xf32> to vector<32x1xf32>
    %cst_26 = arith.constant 0.00255102036 : f32
    %52 = vector.broadcast %cst_26 : f32 to vector<32x1xf32>
    %53 = arith.mulf %48, %52 : vector<32x1xf32>
    %cst_27 = arith.constant 0.00255102036 : f32
    %54 = vector.broadcast %cst_27 : f32 to vector<32x1xf32>
    %55 = arith.mulf %51, %54 : vector<32x1xf32>
    %56 = arith.mulf %53, %53 : vector<32x1xf32>
    %57 = arith.subf %55, %56 : vector<32x1xf32>
    %cst_28 = arith.constant 9.99999974E-6 : f32
    %58 = vector.broadcast %cst_28 : f32 to vector<32x1xf32>
    %59 = arith.addf %57, %58 : vector<32x1xf32>
    %60 = math.rsqrt %59 : vector<32x1xf32>
    %61 = vector.extract_strided_slice %46 {offsets = [0, 0, 0], sizes = [1, 32, 1], strides = [1, 1, 1]} : vector<2x32x1xf32> to vector<1x32x1xf32>
    %62 = vector.shape_cast %61 : vector<1x32x1xf32> to vector<32x1xf32>
    %63 = arith.mulf %60, %62 : vector<32x1xf32>
    %64 = vector.extract_strided_slice %46 {offsets = [1, 0, 0], sizes = [1, 32, 1], strides = [1, 1, 1]} : vector<2x32x1xf32> to vector<1x32x1xf32>
    %65 = vector.shape_cast %64 : vector<1x32x1xf32> to vector<32x1xf32>
    %66 = arith.mulf %53, %63 : vector<32x1xf32>
    %67 = arith.subf %65, %66 : vector<32x1xf32>
    %68 = vector.broadcast %63 : vector<32x1xf32> to vector<32x512xf32>
    %69 = arith.mulf %44, %68 : vector<32x512xf32>
    %70 = vector.broadcast %67 : vector<32x1xf32> to vector<32x512xf32>
    %71 = arith.addf %69, %70 : vector<32x512xf32>
    %cst_29 = arith.constant 0.000000e+00 : f32
    %72 = vector.broadcast %cst_29 : f32 to vector<32x512xf32>
    %73 = arith.maximumf %71, %72 : vector<32x512xf32>
    %74 = vector.broadcast %4 : vector<1x512xf32> to vector<32x512xf32>
    %75 = arith.mulf %73, %74 : vector<32x512xf32>
    %c0_30 = arith.constant 0 : index
    %c0_31 = arith.constant 0 : index
    %76 = vector.load %arg4[%c0_30, %c0_31] : memref<2x32xf32, #tpu.memory_space<vmem>>, vector<1x32xf32>
    %c1_32 = arith.constant 1 : index
    %c0_33 = arith.constant 0 : index
    %77 = vector.load %arg4[%c1_32, %c0_33] : memref<2x32xf32, #tpu.memory_space<vmem>>, vector<1x1xf32>
    %cst_34 = arith.constant dense<0.000000e+00> : vector<1x512xf32>
    %78 = tpu.matmul %76, %75, %cst_34 {dimension_numbers = #tpu.dot_dimension_numbers<[1], [0], [0], [1], [0, 0, 1, 1], [], []>} : vector<1x32xf32>, vector<32x512xf32>, vector<1x512xf32> -> vector<1x512xf32>
    %79 = vector.broadcast %77 : vector<1x1xf32> to vector<1x512xf32>
    %80 = arith.addf %78, %79 : vector<1x512xf32>
    %81 = arith.negf %80 : vector<1x512xf32>
    %82 = math.exp %81 : vector<1x512xf32>
    %cst_35 = arith.constant 1.000000e+00 : f32
    %83 = vector.broadcast %cst_35 : f32 to vector<1x512xf32>
    %84 = arith.addf %83, %82 : vector<1x512xf32>
    %85 = arith.divf %83, %84 : vector<1x512xf32>
    %c0_36 = arith.constant 0 : index
    %c0_37 = arith.constant 0 : index
    %86 = vector.load %arg5[%c0_36, %c0_37] : memref<1x512xf32, #tpu.memory_space<vmem>>, vector<1x512xf32>
    tpu.vector_store %arg5[%c0_36, %c0_37], %85 {strides = array<i32>} : memref<1x512xf32, #tpu.memory_space<vmem>>, vector<1x512xf32>,
    return
  }
}

</mosaic_0001>

<bundles_post_ra>
// kernel: discriminator_forward.1
= control target key start
LH: loop header
LB: loop body
LE: loop exit
PB: predicated region body
PF: predicated region fallthrough
CT: control target
= control target key end

     0   :  { %v1426_v3 = vmov 0.0   ;;  %vm74_vm0 = vcmask 1044480   ;;  %vm61_vm1 = vcmask 302080   ;;  %vm269_vm2 = vcmask 261120   ;;  %s1870_s0 = inlined_call_operand.vmem [shape: f32[37,512], index: 0, kind: input, shape index: {}]   ;;  %s1871_s1 = inlined_call_operand.vmem [shape: f32[32,37], index: 1, kind: input, shape index: {}]   ;;  %s1872_s2 = inlined_call_operand.vmem [shape: f32[2,32,32], index: 2, kind: input, shape index: {}]   ;;  %s1873_s3 = inlined_call_operand.vmem [shape: f32[2,2,32,1], index: 3, kind: input, shape index: {}]   ;;  %s1874_s4 = inlined_call_operand.vmem [shape: f32[2,32], index: 4, kind: input, shape index: {}]   ;;  %s1875_s5 = inlined_call_operand.vmem [shape: f32[1,512], index: 5, kind: output, shape index: {}]  }
   0x1   :  { %v42_v0 = vld [vmem:[%s1870_s0 + $0x8] sm:$0xff]  ;;  %v44_v2 = vld [vmem:[%s1870_s0 + $0x18] sm:$0xff]  ;;  %151 = vmatprep.mubr.f32.mxu0 %v1426_v3  ;;  %240 = vmatprep.mubr.f32.mxu1 %v1426_v3  ;;  %v41_v6 = vld [vmem:[%s1870_s0] sm:$0xff] }
   0x2   :  { %v46_v1 = vld [vmem:[%s1870_s0 + $0x28] sm:$0xff]  ;;  %v48_v5 = vld [vmem:[%s1870_s0 + $0x38] sm:$0xff]  ;;  %v45_v7 = vld [vmem:[%s1870_s0 + $0x20] sm:$0xff] }
   0x3   :  { %v1325_v4 = vpack.c.bf16 %v46_v1, %v42_v0  ;;  %v1333_v8 = vpack.c.bf16 %v48_v5, %v44_v2  ;;  %v1327_v9 = vpack.c.bf16 %v45_v7, %v41_v6  ;;  %v43_v10 = vld [vmem:[%s1870_s0 + $0x10] sm:$0xff]  ;;  %v50_v12 = vld [vmem:[%s1870_s0 + $0x48] sm:$0xff]  ;;  %v52_v15 = vld [vmem:[%s1870_s0 + $0x58] sm:$0xff] }
   0x4   :  { %v47_v11 = vld [vmem:[%s1870_s0 + $0x30] sm:$0xff]  ;;  %v54_v14 = vld [vmem:[%s1870_s0 + $0x68] sm:$0xff]  ;;  %v56_v16 = vld [vmem:[%s1870_s0 + $0x78] sm:$0xff] }
   0x5   :  { %1326 = vmatprep.subr.bf16.mxu0 %v1325_v4  ;;  %v1335_v13 = vpack.c.bf16 %v47_v11, %v43_v10  ;;  %1334 = vmatprep.subr.bf16.mxu1 %v1333_v8  ;;  %v1329_v17 = vpack.c.bf16 %v54_v14, %v50_v12  ;;  %v1337_v18 = vpack.c.bf16 %v56_v16, %v52_v15  ;;  %v49_v19 = vld [vmem:[%s1870_s0 + $0x40] sm:$0xff]  ;;  %v51_v21 = vld [vmem:[%s1870_s0 + $0x50] sm:$0xff]  ;;  %v58_v25 = vld [vmem:[%s1870_s0 + $0x88] sm:$0x1f] }
   0x6   :  { %1328 = vmatpush1.bf16.msra.mxu0 %v1327_v9  ;;  %v53_v20 = vld [vmem:[%s1870_s0 + $0x60] sm:$0xff]  ;;  %v55_v23 = vld [vmem:[%s1870_s0 + $0x70] sm:$0xff]  ;;  %v60_v26 = vld [vmem:[%s1870_s0 + $0x98] sm:$0x1f] }
   0x7   :  { %1336 = vmatpush1.bf16.msra.mxu1 %v1335_v13  ;;  %v1331_v22 = vpack.c.bf16 %v53_v20, %v49_v19  ;;  %1330 = vmatprep.subr.bf16.mxu0 %v1329_v17  ;;  %v1339_v24 = vpack.c.bf16 %v55_v23, %v51_v21  ;;  %v57_v27 = vld [vmem:[%s1870_s0 + $0x80] sm:$0x1f]  ;;  %v59_v28 = vld [vmem:[%s1870_s0 + $0x90] sm:$0x1f]  ;;  %v38_v30 = vld [vmem:[%s1871_s1 + $0x8] sm:$0xff] }
   0x8   :  { %1338 = vmatprep.subr.bf16.mxu1 %v1337_v18  ;;  %v37_v29 = vld [vmem:[%s1871_s1] sm:$0xff]  ;;  %v39_v31 = vld [vmem:[%s1871_s1 + $0x10] sm:$0xff]  ;;  %v40_v32 = vld [vmem:[%s1871_s1 + $0x18] sm:$0xff] }
   0x9   :  { %v265_v57 = vld [vmem:[%s1872_s2] sm:$0xff]  ;;  %v266_v58 = vld [vmem:[%s1872_s2 + $0x8] sm:$0xff]  ;;  %v267_v59 = vld [vmem:[%s1872_s2 + $0x10] sm:$0xff] }
   0xa   :  { %1332 = vmatpush1.bf16.msra.mxu0 %v1331_v22  ;;  %v268_v60 = vld [vmem:[%s1872_s2 + $0x18] sm:$0xff] }
   0xb   :  { %1340 = vmatpush1.bf16.msra.mxu1 %v1339_v24  ;;  %1279 = vmatprep.subr.msk.mxu0 %vm74_vm0, %v58_v25 }
   0xc   :  { %1285 = vmatprep.subr.msk.mxu1 %vm74_vm0, %v60_v26 }
   0xe   :  { %1280 = vmatpush1.msk.msra.mxu0 %vm74_vm0, %v57_v27 }
   0xf   :  { %1286 = vmatpush1.msk.msra.mxu1 %vm74_vm0, %v59_v28  ;;  %1281 = vmatmul.mubr.msk.f32.vlgmr.msra.gmra.mrb[0].mxu0 %vm61_vm1, %v37_v29 }
  0x10   :  { %1287 = vmatmul.mubr.msk.f32.vlgmr.msra.gmra.mrb[0].mxu1 %vm61_vm1, %v37_v29  ;;  %157 = vmatprep.mubr.f32.mxu0 %v1426_v3 }
  0x11   :  { %246 = vmatprep.mubr.f32.mxu1 %v1426_v3 }
  0x13   :  { %1282 = vmatmul.mubr.msk.f32.gmra.mrb[2].mxu0 %vm61_vm1, %v38_v30 }
  0x14   :  { %1288 = vmatmul.mubr.msk.f32.gmra.mrb[2].mxu1 %vm61_vm1, %v38_v30  ;;  %163 = vmatprep.mubr.f32.mxu0 %v1426_v3 }
  0x15   :  { %252 = vmatprep.mubr.f32.mxu1 %v1426_v3 }
  0x17   :  { %1283 = vmatmul.mubr.msk.f32.gmra.mrb[4].mxu0 %vm61_vm1, %v39_v31 }
  0x18   :  { %1289 = vmatmul.mubr.msk.f32.gmra.mrb[4].mxu1 %vm61_vm1, %v39_v31  ;;  %169 = vmatprep.mubr.f32.mxu0 %v1426_v3 }
  0x19   :  { %258 = vmatprep.mubr.f32.mxu1 %v1426_v3 }
  0x1b   :  { %1284 = vmatmul.mubr.msk.f32.gmra.mrb[6].mxu0 %vm61_vm1, %v40_v32 }
  0x1c   :  { %1290 = vmatmul.mubr.msk.f32.gmra.mrb[6].mxu1 %vm61_vm1, %v40_v32  ;;  %346 = vmatprep.mubr.f32.mxu0 %v1426_v3 }
  0x1d   :  { %435 = vmatprep.mubr.f32.mxu1 %v1426_v3 }
  0xe2   :  { %v153_v33 = vpop.f32.mrb[0].mxu0 }
  0xe3   :  { %v155_v34 = vpop.f32.mrb[1].mxu0  ;;  %v242_v35 = vpop.f32.mrb[0].mxu1 }
  0xe4   :  { %v244_v36 = vpop.f32.mrb[1].mxu1 }
  0xe6   :  { %v159_v37 = vpop.f32.mrb[2].mxu0 }
  0xe7   :  { %v1343_v38 = vpack.c.bf16 %v159_v37, %v153_v33  ;;  %v248_v39 = vpop.f32.mrb[2].mxu1  ;;  %v161_v40 = vpop.f32.mrb[3].mxu0 }
  0xe8   :  { %v1351_v41 = vpack.c.bf16 %v248_v39, %v242_v35  ;;  %v1341_v42 = vpack.c.bf16 %v161_v40, %v155_v34  ;;  %v250_v43 = vpop.f32.mrb[3].mxu1 }
  0xe9   :  { %v1349_v44 = vpack.c.bf16 %v250_v43, %v244_v36 }
  0xea   :  { %v165_v45 = vpop.f32.mrb[4].mxu0  ;;  %1342 = vmatprep.subr.bf16.mxu0 %v1341_v42 }
  0xeb   :  { %1350 = vmatprep.subr.bf16.mxu1 %v1349_v44  ;;  %v167_v46 = vpop.f32.mrb[5].mxu0  ;;  %1344 = vmatpush1.bf16.msra.mxu0 %v1343_v38  ;;  %v254_v47 = vpop.f32.mrb[4].mxu1 }
  0xec   :  { %1352 = vmatpush1.bf16.msra.mxu1 %v1351_v41  ;;  %v256_v48 = vpop.f32.mrb[5].mxu1 }
  0xee   :  { %v171_v49 = vpop.f32.mrb[6].mxu0 }
  0xef   :  { %v1347_v50 = vpack.c.bf16 %v171_v49, %v165_v45  ;;  %v260_v51 = vpop.f32.mrb[6].mxu1  ;;  %v173_v52 = vpop.f32.mrb[7].mxu0 }
  0xf0   :  { %v1355_v53 = vpack.c.bf16 %v260_v51, %v254_v47  ;;  %v1345_v54 = vpack.c.bf16 %v173_v52, %v167_v46  ;;  %v262_v55 = vpop.f32.mrb[7].mxu1 }
  0xf1   :  { %v1353_v56 = vpack.c.bf16 %v262_v55, %v256_v48 }
  0xf2   :  { %1346 = vmatprep.subr.bf16.mxu0 %v1345_v54  ;;  %v1427_v54 = vmov 0  }
  0xf3   :  { %1354 = vmatprep.subr.bf16.mxu1 %v1353_v56  ;;  %1348 = vmatpush1.bf16.msra.mxu0 %v1347_v50 }
  0xf4   :  { %1356 = vmatpush1.bf16.msra.mxu1 %v1355_v53  ;;  %1392 = vset.pattern.permute.xlu0 %v1427_v54 }
  0xf5   :  { %1393 = vset.pattern.permute.xlu1 %v1427_v54 }
  0xf6   :  { %1291 = vmatmul.mubr.msk.f32.vlgmr.msra.gmra.mrb[8].mxu0 %vm269_vm2, %v265_v57 }
  0xf7   :  { %1295 = vmatmul.mubr.msk.f32.vlgmr.msra.gmra.mrb[8].mxu1 %vm269_vm2, %v265_v57  ;;  %352 = vmatprep.mubr.f32.mxu0 %v1426_v3 }
  0xf8   :  { %441 = vmatprep.mubr.f32.mxu1 %v1426_v3 }
  0xfa   :  { %1292 = vmatmul.mubr.msk.f32.gmra.mrb[10].mxu0 %vm269_vm2, %v266_v58 }
  0xfb   :  { %1296 = vmatmul.mubr.msk.f32.gmra.mrb[10].mxu1 %vm269_vm2, %v266_v58  ;;  %358 = vmatprep.mubr.f32.mxu0 %v1426_v3 }
  0xfc   :  { %447 = vmatprep.mubr.f32.mxu1 %v1426_v3 }
  0xfe   :  { %1293 = vmatmul.mubr.msk.f32.gmra.mrb[12].mxu0 %vm269_vm2, %v267_v59 }
  0xff   :  { %364 = vmatprep.mubr.f32.mxu0 %v1426_v3  ;;  %1297 = vmatmul.mubr.msk.f32.gmra.mrb[12].mxu1 %vm269_vm2, %v267_v59 }
 0x100   :  { %453 = vmatprep.mubr.f32.mxu1 %v1426_v3 }
 0x102   :  { %1294 = vmatmul.mubr.msk.f32.gmra.mrb[14].mxu0 %vm269_vm2, %v268_v60 }
 0x103   :  { %1298 = vmatmul.mubr.msk.f32.gmra.mrb[14].mxu1 %vm269_vm2, %v268_v60  ;;  %745 = vmatprep.mubr.f32.mxu0 %v1426_v3 }
 0x104   :  { %834 = vmatprep.mubr.f32.mxu1 %v1426_v3 }
 0x1c9   :  { %v1577_v61 = vpop.f32.mrb[8].mxu0 }
 0x1ca   :  { %v488_v62 = vmul.f32 %v1577_v61, %v1577_v61  ;;  %v1581_v63 = vpop.f32.mrb[9].mxu0  ;;  %v1583_v0 = vpop.f32.mrb[8].mxu1 }
 0x1cb   :  { %v468_v1 = vadd.f32 %v1581_v63, %v1577_v61  ;;  %v489_v2 = vmul.f32 %v1581_v63, %v1581_v63  ;;  %v1589_v4 = vpop.f32.mrb[9].mxu1  ;;  %v490_v5 = vmul.f32 %v1583_v0, %v1583_v0 }
 0x1cc   :  { %v491_v17 = vmul.f32 %v1589_v4, %v1589_v4 }
 0x1cd   :  { %v1593_v6 = vpop.f32.mrb[10].mxu0  ;;  %v469_v7 = vadd.f32 %v468_v1, %v1583_v0  ;;  %v504_v8 = vadd.f32 %v489_v2, %v488_v62 }
 0x1ce   :  { %v492_v9 = vmul.f32 %v1593_v6, %v1593_v6  ;;  %v1598_v10 = vpop.f32.mrb[11].mxu0  ;;  %v1600_v11 = vpop.f32.mrb[10].mxu1 }
 0x1cf   :  { %v473_v12 = vadd.f32 %v1598_v10, %v1593_v6  ;;  %v493_v13 = vmul.f32 %v1598_v10, %v1598_v10  ;;  %v1606_v14 = vpop.f32.mrb[11].mxu1  ;;  %v470_v15 = vadd.f32 %v469_v7, %v1589_v4  ;;  %v494_v16 = vmul.f32 %v1600_v11, %v1600_v11 }
 0x1d0   :  { %v505_v18 = vadd.f32 %v504_v8, %v490_v5  ;;  %v495_v31 = vmul.f32 %v1606_v14, %v1606_v14 }
 0x1d1   :  { %471 = vadd.xlane.f32.xlu0 %v470_v15  ;;  %v1613_v19 = vpop.f32.mrb[12].mxu0  ;;  %v474_v20 = vadd.f32 %v473_v12, %v1600_v11  ;;  %v509_v21 = vadd.f32 %v493_v13, %v492_v9 }
 0x1d2   :  { %v496_v22 = vmul.f32 %v1613_v19, %v1613_v19  ;;  %v1618_v23 = vpop.f32.mrb[13].mxu0  ;;  %v506_v24 = vadd.f32 %v505_v18, %v491_v17  ;;  %v1620_v25 = vpop.f32.mrb[12].mxu1 }
 0x1d3   :  { %v478_v26 = vadd.f32 %v1618_v23, %v1613_v19  ;;  %v497_v27 = vmul.f32 %v1618_v23, %v1618_v23  ;;  %v475_v28 = vadd.f32 %v474_v20, %v1606_v14  ;;  %v1627_v29 = vpop.f32.mrb[13].mxu1  ;;  %v498_v30 = vmul.f32 %v1620_v25, %v1620_v25 }
 0x1d4   :  { %507 = vadd.xlane.f32.xlu1 %v506_v24  ;;  %v510_v32 = vadd.f32 %v509_v21, %v494_v16  ;;  %v499_v40 = vmul.f32 %v1627_v29, %v1627_v29 }
 0x1d5   :  { %476 = vadd.xlane.f32.xlu0 %v475_v28  ;;  %v1633_v33 = vpop.f32.mrb[14].mxu0  ;;  %v479_v34 = vadd.f32 %v478_v26, %v1620_v25  ;;  %v514_v35 = vadd.f32 %v497_v27, %v496_v22  ;;  %v460_v28 = vld [vmem:[%s1873_s3] sm:$0xff] }
 0x1d6   :  { %v500_v36 = vmul.f32 %v1633_v33, %v1633_v33  ;;  %v1638_v37 = vpop.f32.mrb[15].mxu0  ;;  %v511_v38 = vadd.f32 %v510_v32, %v495_v31  ;;  %v1640_v39 = vpop.f32.mrb[14].mxu1 }
 0x1d7   :  { %v483_v41 = vadd.f32 %v1638_v37, %v1633_v33  ;;  %v501_v42 = vmul.f32 %v1638_v37, %v1638_v37  ;;  %v502_v43 = vmul.f32 %v1640_v39, %v1640_v39  ;;  %v480_v44 = vadd.f32 %v479_v34, %v1627_v29  ;;  %v1651_v45 = vpop.f32.mrb[15].mxu1 }
 0x1d8   :  { %512 = vadd.xlane.f32.xlu1 %v511_v38  ;;  %v515_v46 = vadd.f32 %v514_v35, %v498_v30  ;;  %v503_v48 = vmul.f32 %v1651_v45, %v1651_v45  ;;  %v461_v35 = vld [vmem:[%s1873_s3 + $0x8] sm:$0xff] }
 0x1d9   :  { %481 = vadd.xlane.f32.xlu0 %v480_v44  ;;  %v484_v47 = vadd.f32 %v483_v41, %v1640_v39  ;;  %v519_v49 = vadd.f32 %v501_v42, %v500_v36  ;;  %v464_v42 = vld [vmem:[%s1873_s3 + $0x20] sm:$0xff] }
 0x1da   :  { %v516_v50 = vadd.f32 %v515_v46, %v499_v40  ;;  %v465_v46 = vld [vmem:[%s1873_s3 + $0x28] sm:$0xff] }
 0x1db   :  { %v485_v51 = vadd.f32 %v484_v47, %v1651_v45  ;;  %v520_v52 = vadd.f32 %v519_v49, %v502_v43  ;;  %v462_v49 = vld [vmem:[%s1873_s3 + $0x10] sm:$0xff] }
 0x1dd   :  { %517 = vadd.xlane.f32.xlu0 %v516_v50  ;;  %486 = vadd.xlane.f32.xlu1 %v485_v51  ;;  %v521_v53 = vadd.f32 %v520_v52, %v503_v48  ;;  %v463_v52 = vld [vmem:[%s1873_s3 + $0x18] sm:$0xff] }
 0x1e1   :  { %522 = vadd.xlane.f32.xlu1 %v521_v53 }
 0x25e   :  { %v472_v55 = vpop.xlane.xlu0 %471 }
 0x25f   :  { %v524_v56 = vmul.f32 0.0025510204, %v472_v55  ;;  %v466_v55 = vld [vmem:[%s1873_s3 + $0x30] sm:$0xff] }
 0x261   :  { %v532_v57 = vmul.f32 %v524_v56, %v524_v56  ;;  %v508_v58 = vpop.xlane.xlu1 %507 }
 0x262   :  { %v528_v59 = vmul.f32 0.0025510204, %v508_v58  ;;  %v477_v60 = vpop.xlane.xlu0 %476  ;;  %v467_v58 = vld [vmem:[%s1873_s3 + $0x38] sm:$0xff] }
 0x263   :  { %v525_v62 = vmul.f32 0.0025510204, %v477_v60  ;;  %v20_v60 = vlaneseq }
 0x264   :  { %v536_v1 = vsub.f32 %v528_v59, %v532_v57 }
 0x265   :  { %v533_v2 = vmul.f32 %v525_v62, %v525_v62  ;;  %v513_v5 = vpop.xlane.xlu1 %512  ;;  %vm1271_vm4 = vcmp.lt.s32.totalorder %v20_v60, 512 }
 0x266   :  { %v540_v7 = vadd.f32 1e-05, %v536_v1  ;;  %v529_v8 = vmul.f32 0.0025510204, %v513_v5  ;;  %v482_v9 = vpop.xlane.xlu0 %481 }
 0x267   :  { %v526_v12 = vmul.f32 0.0025510204, %v482_v9 }
 0x268   :  { %1394 = vrsqrt.f32 %v540_v7  ;;  %v537_v13 = vsub.f32 %v529_v8, %v533_v2 }
 0x269   :  { %v534_v16 = vmul.f32 %v526_v12, %v526_v12 }
 0x26a   :  { %v541_v15 = vadd.f32 1e-05, %v537_v13  ;;  %v518_v17 = vpop.xlane.xlu0 %517  ;;  %v487_v18 = vpop.xlane.xlu1 %486 }
 0x26b   :  { %v530_v20 = vmul.f32 0.0025510204, %v518_v17  ;;  %v527_v21 = vmul.f32 0.0025510204, %v487_v18 }
 0x26c   :  { %1396 = vrsqrt.f32 %v541_v15 }
 0x26d   :  { %v538_v22 = vsub.f32 %v530_v20, %v534_v16  ;;  %v535_v24 = vmul.f32 %v527_v21, %v527_v21 }
 0x26e   :  { %v523_v26 = vpop.xlane.xlu1 %522 }
 0x26f   :  { %v531_v27 = vmul.f32 0.0025510204, %v523_v26  ;;  %v542_v31 = vadd.f32 1e-05, %v538_v22 }
 0x271   :  { %v539_v32 = vsub.f32 %v531_v27, %v535_v24  ;;  %1398 = vrsqrt.f32 %v542_v31 }
 0x272   :  { %v1395_v30 = vpop.eup %1394 }
 0x273   :  { %v548_v34 = vmul.f32 %v1395_v30, %v460_v28  ;;  %v543_v38 = vadd.f32 1e-05, %v539_v32 }
 0x275   :  { %562 = vperm.xlu0 %1392, %v548_v34   ;;  %v552_v41 = vmul.f32 %v548_v34, %v524_v56  ;;  %1400 = vrsqrt.f32 %v543_v38 }
 0x276   :  { %v1397_v36 = vpop.eup %1396 }
 0x277   :  { %v549_v40 = vmul.f32 %v1397_v36, %v461_v35  ;;  %v556_v43 = vsub.f32 %v464_v42, %v552_v41 }
 0x279   :  { %567 = vperm.xlu1 %1393, %v549_v40   ;;  %v553_v44 = vmul.f32 %v549_v40, %v525_v62  ;;  %v21_v62 = vand.u32 127, %v20_v60 }
 0x27b   :  { %v557_v47 = vsub.f32 %v465_v46, %v553_v44  ;;  %v1399_v48 = vpop.eup %1398  ;;  %v24_v5 = vadd.s32 384, %v21_v62 }
 0x27c   :  { %v550_v50 = vmul.f32 %v1399_v48, %v462_v49 }
 0x27d   :  { %598 = vperm.xlu1 %1393, %v556_v43   ;;  %vm28_vm3 = vcmp.lt.s32.totalorder %v24_v5, 392 }
 0x27e   :  { %v554_v54 = vmul.f32 %v550_v50, %v526_v12 }
 0x27f   :  { %v1401_v51 = vpop.eup %1400 }
 0x280   :  { %v551_v53 = vmul.f32 %v1401_v51, %v463_v52  ;;  %v558_v56 = vsub.f32 %v466_v55, %v554_v54 }
 0x281   :  { %603 = vperm.xlu1 %1393, %v557_v47  }
 0x282   :  { %v555_v57 = vmul.f32 %v551_v53, %v527_v21 }
 0x284   :  { %v559_v59 = vsub.f32 %v467_v58, %v555_v57 }
 0x285   :  { %572 = vperm.xlu1 %1393, %v550_v50  }
 0x289   :  { %577 = vperm.xlu1 %1393, %v551_v53  }
 0x28d   :  { %608 = vperm.xlu1 %1393, %v558_v56  }
 0x291   :  { %613 = vperm.xlu1 %1393, %v559_v59  }
 0x2f4   :  { %v563_v1 = vpop.permute.xlu0 %562 }
 0x2f5   :  { %v583_v7 = vmul.f32 %v563_v1, %v1589_v4  ;;  %v580_v12 = vmul.f32 %v563_v1, %v1577_v61  ;;  %v581_v13 = vmul.f32 %v563_v1, %v1581_v63  ;;  %v582_v15 = vmul.f32 %v563_v1, %v1583_v0 }
 0x2f6   :  { %v1691_v0 = vsel %vm28_vm3, 1.0, %v1426_v3 }
 0x2f8   :  { %v568_v2 = vpop.permute.xlu1 %567 }
 0x2f9   :  { %v584_v16 = vmul.f32 %v568_v2, %v1593_v6  ;;  %v585_v17 = vmul.f32 %v568_v2, %v1598_v10  ;;  %v586_v18 = vmul.f32 %v568_v2, %v1600_v11  ;;  %v587_v20 = vmul.f32 %v568_v2, %v1606_v14 }
 0x2fc   :  { %v599_v8 = vpop.permute.xlu1 %598 }
 0x2fd   :  { %v619_v9 = vadd.f32 %v599_v8, %v583_v7  ;;  %v616_v21 = vadd.f32 %v599_v8, %v580_v12  ;;  %v617_v22 = vadd.f32 %v599_v8, %v581_v13  ;;  %v618_v4 = vadd.f32 %v599_v8, %v582_v15  ;;  %v1299_v15 = vld [vmem:[%s1872_s2 + $0x20] sm:$0xff] }
 0x2ff   :  { %v635_v24 = vmax.f32 %v619_v9, 0.0  ;;  %v632_v32 = vmax.f32 %v616_v21, 0.0  ;;  %v634_v11 = vmax.f32 %v618_v4, 0.0  ;;  %v633_v14 = vmax.f32 %v617_v22, 0.0 }
 0x300   :  { %v604_v26 = vpop.permute.xlu1 %603 }
 0x301   :  { %v620_v27 = vadd.f32 %v604_v26, %v584_v16  ;;  %v621_v61 = vadd.f32 %v604_v26, %v585_v17  ;;  %v622_v28 = vadd.f32 %v604_v26, %v586_v18  ;;  %v623_v63 = vadd.f32 %v604_v26, %v587_v20  ;;  %v1300_v16 = vld [vmem:[%s1872_s2 + $0x28] sm:$0xff]  ;;  %v1301_v17 = vld [vmem:[%s1872_s2 + $0x30] sm:$0xff]  ;;  %v1302_v18 = vld [vmem:[%s1872_s2 + $0x38] sm:$0xff] }
 0x302   :  { %v651_v35 = vmul.f32 %v1691_v0, %v635_v24 }
 0x303   :  { %v636_v30 = vmax.f32 %v620_v27, 0.0  ;;  %v638_v6 = vmax.f32 %v622_v28, 0.0  ;;  %v639_v31 = vmax.f32 %v623_v63, 0.0  ;;  %v637_v10 = vmax.f32 %v621_v61, 0.0 }
 0x304   :  { %v573_v34 = vpop.permute.xlu1 %572 }
 0x305   :  { %v1357_v36 = vpack.c.bf16 %v637_v10, %v633_v14  ;;  %v1359_v38 = vpack.c.bf16 %v636_v30, %v632_v32  ;;  %v655_v40 = vmul.f32 %v1691_v0, %v639_v31  ;;  %v1367_v41 = vpack.c.bf16 %v638_v6, %v634_v11 }
 0x306   :  { %v591_v44 = vmul.f32 %v573_v34, %v1627_v29  ;;  %v588_v46 = vmul.f32 %v573_v34, %v1613_v19  ;;  %v589_v47 = vmul.f32 %v573_v34, %v1618_v23  ;;  %v590_v48 = vmul.f32 %v573_v34, %v1620_v25 }
 0x307   :  { %1358 = vmatprep.subr.bf16.mxu0 %v1357_v36  ;;  %v1365_v43 = vpack.c.bf16 %v655_v40, %v651_v35 }
 0x308   :  { %v578_v42 = vpop.permute.xlu1 %577  ;;  %1360 = vmatpush1.bf16.msra.mxu0 %v1359_v38 }
 0x309   :  { %1366 = vmatprep.subr.bf16.mxu1 %v1365_v43  ;;  %v592_v54 = vmul.f32 %v578_v42, %v1633_v33  ;;  %v593_v55 = vmul.f32 %v578_v42, %v1638_v37  ;;  %v594_v56 = vmul.f32 %v578_v42, %v1640_v39  ;;  %v595_v29 = vmul.f32 %v578_v42, %v1651_v45 }
 0x30a   :  { %1368 = vmatpush1.bf16.msra.mxu1 %v1367_v41 }
 0x30c   :  { %v609_v49 = vpop.permute.xlu1 %608 }
 0x30d   :  { %v627_v50 = vadd.f32 %v609_v49, %v591_v44  ;;  %v624_v51 = vadd.f32 %v609_v49, %v588_v46  ;;  %v625_v52 = vadd.f32 %v609_v49, %v589_v47  ;;  %v626_v53 = vadd.f32 %v609_v49, %v590_v48 }
 0x30f   :  { %v643_v57 = vmax.f32 %v627_v50, 0.0  ;;  %v640_v25 = vmax.f32 %v624_v51, 0.0  ;;  %v642_v1 = vmax.f32 %v626_v53, 0.0  ;;  %v641_v2 = vmax.f32 %v625_v52, 0.0 }
 0x310   :  { %v614_v58 = vpop.permute.xlu1 %613 }
 0x311   :  { %v628_v19 = vadd.f32 %v614_v58, %v592_v54  ;;  %v629_v59 = vadd.f32 %v614_v58, %v593_v55  ;;  %v630_v23 = vadd.f32 %v614_v58, %v594_v56  ;;  %v631_v62 = vadd.f32 %v614_v58, %v595_v29 }
 0x312   :  { %v659_v33 = vmul.f32 %v1691_v0, %v643_v57 }
 0x313   :  { %v644_v5 = vmax.f32 %v628_v19, 0.0  ;;  %v646_v7 = vmax.f32 %v630_v23, 0.0  ;;  %v647_v8 = vmax.f32 %v631_v62, 0.0  ;;  %v645_v9 = vmax.f32 %v629_v59, 0.0 }
 0x315   :  { %v1361_v37 = vpack.c.bf16 %v645_v9, %v641_v2  ;;  %v1363_v12 = vpack.c.bf16 %v644_v5, %v640_v25  ;;  %v663_v39 = vmul.f32 %v1691_v0, %v647_v8  ;;  %v1371_v45 = vpack.c.bf16 %v646_v7, %v642_v1 }
 0x317   :  { %1362 = vmatprep.subr.bf16.mxu0 %v1361_v37  ;;  %v1369_v13 = vpack.c.bf16 %v663_v39, %v659_v33 }
 0x318   :  { %1364 = vmatpush1.bf16.msra.mxu0 %v1363_v12 }
 0x319   :  { %1370 = vmatprep.subr.bf16.mxu1 %v1369_v13 }
 0x31a   :  { %1372 = vmatpush1.bf16.msra.mxu1 %v1371_v45 }
 0x31b   :  { %1303 = vmatmul.mubr.msk.f32.vlgmr.msra.gmra.mrb[16].mxu0 %vm269_vm2, %v1299_v15 }
 0x31c   :  { %751 = vmatprep.mubr.f32.mxu0 %v1426_v3 }
 0x31d   :  { %1307 = vmatmul.mubr.msk.f32.vlgmr.msra.gmra.mrb[16].mxu1 %vm269_vm2, %v1299_v15 }
 0x31e   :  { %840 = vmatprep.mubr.f32.mxu1 %v1426_v3 }
 0x31f   :  { %1304 = vmatmul.mubr.msk.f32.gmra.mrb[18].mxu0 %vm269_vm2, %v1300_v16 }
 0x320   :  { %757 = vmatprep.mubr.f32.mxu0 %v1426_v3 }
 0x321   :  { %1308 = vmatmul.mubr.msk.f32.gmra.mrb[18].mxu1 %vm269_vm2, %v1300_v16 }
 0x322   :  { %846 = vmatprep.mubr.f32.mxu1 %v1426_v3 }
 0x323   :  { %1305 = vmatmul.mubr.msk.f32.gmra.mrb[20].mxu0 %vm269_vm2, %v1301_v17 }
 0x324   :  { %763 = vmatprep.mubr.f32.mxu0 %v1426_v3 }
 0x325   :  { %1309 = vmatmul.mubr.msk.f32.gmra.mrb[20].mxu1 %vm269_vm2, %v1301_v17 }
 0x326   :  { %852 = vmatprep.mubr.f32.mxu1 %v1426_v3 }
 0x327   :  { %1306 = vmatmul.mubr.msk.f32.gmra.mrb[22].mxu0 %vm269_vm2, %v1302_v18 }
 0x328   :  { %1138 = vmatprep.mubr.f32.mxu0 %v1426_v3 }
 0x329   :  { %1310 = vmatmul.mubr.msk.f32.gmra.mrb[22].mxu1 %vm269_vm2, %v1302_v18 }
 0x32a   :  { %1209 = vmatprep.mubr.f32.mxu1 %v1426_v3 }
 0x3ee   :  { %v1733_v20 = vpop.f32.mrb[16].mxu0 }
 0x3ef   :  { %v888_v21 = vmul.f32 %v1733_v20, %v1733_v20  ;;  %v1737_v22 = vpop.f32.mrb[17].mxu0 }
 0x3f0   :  { %v868_v4 = vadd.f32 %v1737_v22, %v1733_v20  ;;  %v889_v24 = vmul.f32 %v1737_v22, %v1737_v22  ;;  %v1743_v26 = vpop.f32.mrb[16].mxu1 }
 0x3f1   :  { %v890_v27 = vmul.f32 %v1743_v26, %v1743_v26  ;;  %v1747_v61 = vpop.f32.mrb[17].mxu1 }
 0x3f2   :  { %v1749_v3 = vpop.f32.mrb[18].mxu0  ;;  %v869_v28 = vadd.f32 %v868_v4, %v1743_v26  ;;  %v904_v63 = vadd.f32 %v889_v24, %v888_v21  ;;  %v891_v31 = vmul.f32 %v1747_v61, %v1747_v61 }
 0x3f3   :  { %v892_v30 = vmul.f32 %v1749_v3, %v1749_v3  ;;  %v1754_v6 = vpop.f32.mrb[19].mxu0 }
 0x3f4   :  { %v873_v10 = vadd.f32 %v1754_v6, %v1749_v3  ;;  %v893_v32 = vmul.f32 %v1754_v6, %v1754_v6  ;;  %v1762_v11 = vpop.f32.mrb[18].mxu1  ;;  %v870_v34 = vadd.f32 %v869_v28, %v1747_v61  ;;  %v905_v14 = vadd.f32 %v904_v63, %v890_v27 }
 0x3f5   :  { %v894_v35 = vmul.f32 %v1762_v11, %v1762_v11  ;;  %v1767_v36 = vpop.f32.mrb[19].mxu1 }
 0x3f6   :  { %871 = vadd.xlane.f32.xlu1 %v870_v34  ;;  %v1769_v38 = vpop.f32.mrb[20].mxu0  ;;  %v906_v40 = vadd.f32 %v905_v14, %v891_v31  ;;  %v909_v41 = vadd.f32 %v893_v32, %v892_v30  ;;  %v874_v42 = vadd.f32 %v873_v10, %v1762_v11  ;;  %v895_v46 = vmul.f32 %v1767_v36, %v1767_v36 }
 0x3f7   :  { %v896_v43 = vmul.f32 %v1769_v38, %v1769_v38  ;;  %v1774_v44 = vpop.f32.mrb[21].mxu0 }
 0x3f8   :  { %v878_v47 = vadd.f32 %v1774_v44, %v1769_v38  ;;  %v897_v48 = vmul.f32 %v1774_v44, %v1774_v44  ;;  %v1782_v49 = vpop.f32.mrb[20].mxu1  ;;  %907 = vadd.xlane.f32.xlu0 %v906_v40  ;;  %v910_v50 = vadd.f32 %v909_v41, %v894_v35  ;;  %v875_v51 = vadd.f32 %v874_v42, %v1767_v36 }
 0x3f9   :  { %v898_v52 = vmul.f32 %v1782_v49, %v1782_v49  ;;  %v1787_v53 = vpop.f32.mrb[21].mxu1 }
 0x3fa   :  { %v1789_v54 = vpop.f32.mrb[22].mxu0  ;;  %v911_v55 = vadd.f32 %v910_v50, %v895_v46  ;;  %v879_v56 = vadd.f32 %v878_v47, %v1782_v49  ;;  %v914_v29 = vadd.f32 %v897_v48, %v896_v43  ;;  %v899_v2 = vmul.f32 %v1787_v53, %v1787_v53  ;;  %v1311_v48 = vld [vmem:[%s1873_s3 + $0x40] sm:$0xff] }
 0x3fb   :  { %v900_v57 = vmul.f32 %v1789_v54, %v1789_v54  ;;  %v1794_v58 = vpop.f32.mrb[23].mxu0 }
 0x3fc   :  { %v883_v19 = vadd.f32 %v1794_v58, %v1789_v54  ;;  %v901_v59 = vmul.f32 %v1794_v58, %v1794_v58  ;;  %v1800_v23 = vpop.f32.mrb[22].mxu1  ;;  %912 = vadd.xlane.f32.xlu1 %v911_v55  ;;  %876 = vadd.xlane.f32.xlu0 %v875_v51  ;;  %v880_v62 = vadd.f32 %v879_v56, %v1787_v53 }
 0x3fd   :  { %v902_v25 = vmul.f32 %v1800_v23, %v1800_v23  ;;  %v1805_v1 = vpop.f32.mrb[23].mxu1  ;;  %v915_v5 = vadd.f32 %v914_v29, %v898_v52  ;;  %v1312_v29 = vld [vmem:[%s1873_s3 + $0x48] sm:$0xff] }
 0x3fe   :  { %v884_v7 = vadd.f32 %v883_v19, %v1800_v23  ;;  %v919_v8 = vadd.f32 %v901_v59, %v900_v57  ;;  %v903_v37 = vmul.f32 %v1805_v1, %v1805_v1 }
 0x3ff   :  { %v916_v9 = vadd.f32 %v915_v5, %v899_v2  ;;  %v1313_v5 = vld [vmem:[%s1873_s3 + $0x50] sm:$0xff] }
 0x400   :  { %881 = vadd.xlane.f32.xlu0 %v880_v62  ;;  %v885_v33 = vadd.f32 %v884_v7, %v1805_v1  ;;  %v920_v12 = vadd.f32 %v919_v8, %v902_v25  ;;  %v1316_v62 = vld [vmem:[%s1873_s3 + $0x68] sm:$0xff]  ;;  %v1315_v25 = vld [vmem:[%s1873_s3 + $0x60] sm:$0xff] }
 0x402   :  { %886 = vadd.xlane.f32.xlu1 %v885_v33  ;;  %v921_v39 = vadd.f32 %v920_v12, %v903_v37  ;;  %v1314_v33 = vld [vmem:[%s1873_s3 + $0x58] sm:$0xff] }
 0x404   :  { %917 = vadd.xlane.f32.xlu0 %v916_v9 }
 0x406   :  { %922 = vadd.xlane.f32.xlu1 %v921_v39 }
 0x483   :  { %v872_v45 = vpop.xlane.xlu1 %871 }
 0x484   :  { %v924_v13 = vmul.f32 0.0025510204, %v872_v45 }
 0x485   :  { %v908_v15 = vpop.xlane.xlu0 %907 }
 0x486   :  { %v932_v16 = vmul.f32 %v924_v13, %v924_v13  ;;  %v928_v17 = vmul.f32 0.0025510204, %v908_v15  ;;  %v1318_v15 = vld [vmem:[%s1873_s3 + $0x78] sm:$0xff] }
 0x488   :  { %v936_v18 = vsub.f32 %v928_v17, %v932_v16 }
 0x489   :  { %v913_v21 = vpop.xlane.xlu1 %912  ;;  %v877_v4 = vpop.xlane.xlu0 %876 }
 0x48a   :  { %v940_v24 = vadd.f32 1e-05, %v936_v18  ;;  %v925_v27 = vmul.f32 0.0025510204, %v877_v4  ;;  %v929_v28 = vmul.f32 0.0025510204, %v913_v21 }
 0x48b   :  { %v1065_v21 = vld [vmem:[%s1874_s4 + $0x1] sm:$0x1] }
 0x48c   :  { %1402 = vrsqrt.f32 %v940_v24  ;;  %v933_v63 = vmul.f32 %v925_v27, %v925_v27 }
 0x48d   :  { %v882_v30 = vpop.xlane.xlu0 %881 }
 0x48e   :  { %v937_v31 = vsub.f32 %v929_v28, %v933_v63  ;;  %v926_v10 = vmul.f32 0.0025510204, %v882_v30 }
 0x48f   :  { %v887_v32 = vpop.xlane.xlu1 %886 }
 0x490   :  { %v941_v34 = vadd.f32 1e-05, %v937_v31  ;;  %v927_v14 = vmul.f32 0.0025510204, %v887_v32  ;;  %v934_v40 = vmul.f32 %v926_v10, %v926_v10 }
 0x491   :  { %v918_v35 = vpop.xlane.xlu0 %917 }
 0x492   :  { %1404 = vrsqrt.f32 %v941_v34  ;;  %v930_v41 = vmul.f32 0.0025510204, %v918_v35  ;;  %v935_v43 = vmul.f32 %v927_v14, %v927_v14 }
 0x493   :  { %v923_v42 = vpop.xlane.xlu1 %922 }
 0x494   :  { %v938_v46 = vsub.f32 %v930_v41, %v934_v40  ;;  %v931_v47 = vmul.f32 0.0025510204, %v923_v42 }
 0x496   :  { %v1403_v50 = vpop.eup %1402  ;;  %v942_v51 = vadd.f32 1e-05, %v938_v46  ;;  %v939_v52 = vsub.f32 %v931_v47, %v935_v43 }
 0x497   :  { %v948_v55 = vmul.f32 %v1403_v50, %v1311_v48 }
 0x498   :  { %1406 = vrsqrt.f32 %v942_v51  ;;  %v943_v56 = vadd.f32 1e-05, %v939_v52 }
 0x499   :  { %962 = vperm.xlu0 %1392, %v948_v55   ;;  %v952_v59 = vmul.f32 %v948_v55, %v924_v13  ;;  %v1317_v13 = vld [vmem:[%s1873_s3 + $0x70] sm:$0xff] }
 0x49a   :  { %1408 = vrsqrt.f32 %v943_v56 }
 0x49b   :  { %v956_v8 = vsub.f32 %v1315_v25, %v952_v59 }
 0x49c   :  { %v1405_v57 = vpop.eup %1404 }
 0x49d   :  { %v949_v19 = vmul.f32 %v1405_v57, %v1312_v29 }
 0x49f   :  { %v953_v2 = vmul.f32 %v949_v19, %v925_v27  ;;  %967 = vperm.xlu1 %1393, %v949_v19  }
 0x4a1   :  { %v957_v7 = vsub.f32 %v1316_v62, %v953_v2 }
 0x4a2   :  { %v1407_v9 = vpop.eup %1406 }
 0x4a3   :  { %1003 = vperm.xlu0 %1392, %v957_v7   ;;  %998 = vperm.xlu1 %1393, %v956_v8   ;;  %v950_v37 = vmul.f32 %v1407_v9, %v1313_v5 }
 0x4a4   :  { %v1409_v12 = vpop.eup %1408 }
 0x4a5   :  { %v951_v39 = vmul.f32 %v1409_v12, %v1314_v33  ;;  %v954_v45 = vmul.f32 %v950_v37, %v926_v10 }
 0x4a7   :  { %972 = vperm.xlu1 %1393, %v950_v37   ;;  %977 = vperm.xlu0 %1392, %v951_v39   ;;  %v955_v16 = vmul.f32 %v951_v39, %v927_v14  ;;  %v958_v17 = vsub.f32 %v1317_v13, %v954_v45 }
 0x4a9   :  { %v959_v18 = vsub.f32 %v1318_v15, %v955_v16 }
 0x4ab   :  { %1008 = vperm.xlu1 %1393, %v958_v17   ;;  %1013 = vperm.xlu0 %1392, %v959_v18  }
 0x4af   :  { %1068 = vperm.xlu1 %1393, %v1065_v21  }
 0x518   :  { %v963_v4 = vpop.permute.xlu0 %962 }
 0x519   :  { %v980_v31 = vmul.f32 %v963_v4, %v1733_v20  ;;  %v981_v10 = vmul.f32 %v963_v4, %v1737_v22  ;;  %v982_v32 = vmul.f32 %v963_v4, %v1743_v26  ;;  %v983_v34 = vmul.f32 %v963_v4, %v1747_v61 }
 0x51e   :  { %v968_v24 = vpop.permute.xlu1 %967 }
 0x51f   :  { %v984_v27 = vmul.f32 %v968_v24, %v1749_v3  ;;  %v985_v28 = vmul.f32 %v968_v24, %v1754_v6  ;;  %v986_v63 = vmul.f32 %v968_v24, %v1762_v11  ;;  %v987_v30 = vmul.f32 %v968_v24, %v1767_v36 }
 0x522   :  { %v1004_v14 = vpop.permute.xlu0 %1003  ;;  %v999_v35 = vpop.permute.xlu1 %998 }
 0x523   :  { %v1020_v40 = vadd.f32 %v1004_v14, %v984_v27  ;;  %v1021_v41 = vadd.f32 %v1004_v14, %v985_v28  ;;  %v1022_v42 = vadd.f32 %v1004_v14, %v986_v63  ;;  %v1023_v3 = vadd.f32 %v1004_v14, %v987_v30 }
 0x524   :  { %v1016_v43 = vadd.f32 %v999_v35, %v980_v31  ;;  %v1017_v6 = vadd.f32 %v999_v35, %v981_v10  ;;  %v1018_v46 = vadd.f32 %v999_v35, %v982_v32  ;;  %v1019_v11 = vadd.f32 %v999_v35, %v983_v34  ;;  %v1064_v31 = vld [vmem:[%s1874_s4] sm:$0x1] }
 0x525   :  { %v1036_v47 = vmax.f32 %v1020_v40, 0.0  ;;  %v1038_v36 = vmax.f32 %v1022_v42, 0.0  ;;  %v1039_v48 = vmax.f32 %v1023_v3, 0.0  ;;  %v1037_v20 = vmax.f32 %v1021_v41, 0.0 }
 0x526   :  { %v1032_v50 = vmax.f32 %v1016_v43, 0.0  ;;  %v1034_v22 = vmax.f32 %v1018_v46, 0.0  ;;  %v1035_v51 = vmax.f32 %v1019_v11, 0.0  ;;  %v978_v26 = vpop.permute.xlu0 %977  ;;  %v973_v52 = vpop.permute.xlu1 %972  ;;  %v1033_v61 = vmax.f32 %v1017_v6, 0.0 }
 0x527   :  { %v988_v55 = vmul.f32 %v973_v52, %v1769_v38  ;;  %v989_v56 = vmul.f32 %v973_v52, %v1774_v44  ;;  %v990_v29 = vmul.f32 %v973_v52, %v1782_v49  ;;  %v992_v19 = vmul.f32 %v978_v26, %v1789_v54 }
 0x528   :  { %v1373_v57 = vpack.c.bf16 %v1037_v20, %v1033_v61  ;;  %v993_v59 = vmul.f32 %v978_v26, %v1794_v58  ;;  %v994_v62 = vmul.f32 %v978_v26, %v1800_v23  ;;  %v995_v25 = vmul.f32 %v978_v26, %v1805_v1 }
 0x529   :  { %v1375_v2 = vpack.c.bf16 %v1036_v47, %v1032_v50  ;;  %v991_v5 = vmul.f32 %v973_v52, %v1787_v53  ;;  %v1051_v38 = vmul.f32 %v1691_v0, %v1035_v51  ;;  %v1055_v44 = vmul.f32 %v1691_v0, %v1039_v48 }
 0x52a   :  { %1374 = vmatprep.subr.bf16.mxu0 %v1373_v57  ;;  %v1014_v7 = vpop.permute.xlu0 %1013  ;;  %v1009_v8 = vpop.permute.xlu1 %1008  ;;  %v1383_v49 = vpack.c.bf16 %v1038_v36, %v1034_v22  ;;  %v1428_v26 = vmov 1966171168  }
 0x52b   :  { %v1028_v9 = vadd.f32 %v1014_v7, %v992_v19  ;;  %v1029_v33 = vadd.f32 %v1014_v7, %v993_v59  ;;  %v1030_v54 = vadd.f32 %v1014_v7, %v994_v62  ;;  %v1031_v37 = vadd.f32 %v1014_v7, %v995_v25  ;;  %1376 = vmatpush1.bf16.msra.mxu0 %v1375_v2 }
 0x52c   :  { %v1024_v58 = vadd.f32 %v1009_v8, %v988_v55  ;;  %v1025_v23 = vadd.f32 %v1009_v8, %v989_v56  ;;  %v1026_v12 = vadd.f32 %v1009_v8, %v990_v29  ;;  %v1027_v1 = vadd.f32 %v1009_v8, %v991_v5 }
 0x52d   :  { %v1044_v39 = vmax.f32 %v1028_v9, 0.0  ;;  %v1045_v45 = vmax.f32 %v1029_v33, 0.0  ;;  %v1046_v53 = vmax.f32 %v1030_v54, 0.0  ;;  %v1047_v13 = vmax.f32 %v1031_v37, 0.0 }
 0x52e   :  { %v1040_v15 = vmax.f32 %v1024_v58, 0.0  ;;  %v1042_v16 = vmax.f32 %v1026_v12, 0.0  ;;  %v1043_v17 = vmax.f32 %v1027_v1, 0.0  ;;  %v1381_v18 = vpack.c.bf16 %v1055_v44, %v1051_v38  ;;  %v1069_v10 = vpop.permute.xlu1 %1068 }
 0x52f   :  { %v1041_v21 = vmax.f32 %v1025_v23, 0.0  ;;  %v1063_v4 = vmul.f32 %v1691_v0, %v1047_v13  ;;  %v1247_v52 = vunpack.c.l.s4 %v1428_v26  ;;  %v1250_v55 = vshrl.u32 %v20_v60, 7 }
 0x530   :  { %1382 = vmatprep.subr.bf16.mxu1 %v1381_v18  ;;  %v1379_v24 = vpack.c.bf16 %v1044_v39, %v1040_v15  ;;  %v1059_v27 = vmul.f32 %v1691_v0, %v1043_v17  ;;  %v1387_v28 = vpack.c.bf16 %v1046_v53, %v1042_v16 }
 0x531   :  { %1384 = vmatpush1.bf16.msra.mxu1 %v1383_v49  ;;  %v1377_v63 = vpack.c.bf16 %v1045_v45, %v1041_v21  ;;  %v1248_v61 = vunpack.c.0.s8 %v1247_v52 }
 0x532   :  { %v1385_v30 = vpack.c.bf16 %v1063_v4, %v1059_v27 }
 0x533   :  { %1378 = vmatprep.subr.bf16.mxu0 %v1377_v63  ;;  %v1251_v59 = vsub.s32 %v1248_v61, %v1250_v55 }
 0x534   :  { %1380 = vmatpush1.bf16.msra.mxu0 %v1379_v24  ;;  %1386 = vmatprep.subr.bf16.mxu1 %v1385_v30 }
 0x535   :  { %1388 = vmatpush1.bf16.msra.mxu1 %v1387_v28 }
 0x537   :  { %1319 = vmatmul.mubr.msk.f32.vlgmr.msra.gmra.mrb[24].mxu0 %vm269_vm2, %v1064_v31 }
 0x538   :  { %1320 = vmatmul.mubr.msk.f32.vlgmr.msra.gmra.mrb[24].mxu1 %vm269_vm2, %v1064_v31 }
 0x60a   :  { %v1140_v32 = vpop.f32.mrb[24].mxu0 }
 0x60b   :  { %v1141_v34 = vadd.f32 %v1140_v32, %v1069_v10  ;;  %v1142_v0 = vpop.f32.mrb[25].mxu0  ;;  %v1211_v14 = vpop.f32.mrb[24].mxu1 }
 0x60c   :  { %v1143_v35 = vadd.f32 %v1142_v0, %v1069_v10  ;;  %v1212_v40 = vadd.f32 %v1211_v14, %v1069_v10  ;;  %v1213_v41 = vpop.f32.mrb[25].mxu1 }
 0x60d   :  { %v1321_v42 = vmul.f32 -1.442695, %v1141_v34  ;;  %v1214_v3 = vadd.f32 %v1213_v41, %v1069_v10 }
 0x60e   :  { %v1322_v43 = vmul.f32 -1.442695, %v1143_v35  ;;  %v1323_v6 = vmul.f32 -1.442695, %v1212_v40 }
 0x60f   :  { %1410 = vpow2.f32 %v1321_v42  ;;  %v1324_v46 = vmul.f32 -1.442695, %v1214_v3 }
 0x610   :  { %1412 = vpow2.f32 %v1322_v43 }
 0x611   :  { %1414 = vpow2.f32 %v1323_v6 }
 0x612   :  { %1416 = vpow2.f32 %v1324_v46 }
 0x619   :  { %v1411_v11 = vpop.eup %1410 }
 0x61a   :  { %v1413_v47 = vpop.eup %1412  ;;  %v1228_v36 = vadd.f32 1.0, %v1411_v11 }
 0x61b   :  { %v1415_v48 = vpop.eup %1414  ;;  %v1229_v20 = vadd.f32 1.0, %v1413_v47 }
 0x61c   :  { %v1417_v50 = vpop.eup %1416  ;;  %1418 = vrcp.f32 %v1228_v36  ;;  %v1230_v22 = vadd.f32 1.0, %v1415_v48 }
 0x61d   :  { %1420 = vrcp.f32 %v1229_v20  ;;  %v1231_v51 = vadd.f32 1.0, %v1417_v50 }
 0x61e   :  { %1422 = vrcp.f32 %v1230_v22 }
 0x61f   :  { %1424 = vrcp.f32 %v1231_v51 }
 0x626   :  { %v1419_v56 = vpop.eup %1418 }
 0x627   :  { %v1421_v29 = vpop.eup %1420 }
 0x628   :  { %v1423_v57 = vpop.eup %1422  ;;  %v1244_v19 = vcombine.low %v1419_v56, %v1421_v29 }
 0x629   :  { %v1425_v62 = vpop.eup %1424 }
 0x62a   :  { %v1245_v25 = vcombine.low %v1423_v57, %v1425_v62  ;;  %v1252_v2 = vrot.slane %v1244_v19, %v1251_v59 }
 0x62c   :  { %v1259_v5 = vrot.slane %v1245_v25, %v1251_v59 }
 0x62e   :  { %v1260_v7 = vcombine.low %v1252_v2, %v1259_v5 }
 0x630   :  { %v1267_v8 = vrot.slane %v1260_v7, %v1251_v59 }
 0x632   :  { %1273 = vst.msk [vmem:[%s1875_s5] sm:$0xf] %vm1271_vm4, %v1267_v8 }

</bundles_post_ra>
